<compile_context>
chip_gen: v7x
topology: tpu7x:2x2x1
jax: 0.10.0
libtpu: 0.0.40
codegen_flags: <defaults>
</compile_context>

<pallas_src>
import jax
import jax.numpy as jnp
from jax import lax
from jax.experimental import pallas as pl
from jax.experimental.pallas import tpu as pltpu


_WIN = 128                 # largest branch kernel size; every branch window nests inside it
_STRIDE = 16
_NBLK = _WIN // _STRIDE    # 8 shifted 16-wide sub-blocks
_MAX_PAD = 56              # padding of the largest branch
_HALO = 128                # lane width of the halo block (only 7 columns are used)

# Branch configs from the PyTorch module: (kernel_size, padding); stride = 16 for all.
_CFGS = ((16, 0), (32, 8), (64, 24), (128, 56))


# ----------------------------- Pallas kernel ---------------------------------
def _fused_conv_bn_relu6_kernel(x0_ref, x1_ref, w_ref, shift_ref, o_ref, xs_ref):
    # x0_ref:    (BB, Kb, TL)    block-transposed input tile (bf16); lanes = output positions
    # x1_ref:    (BB, Kb, 128)   128-lane halo (start of next row-tile; only 7 cols used)
    # w_ref:     (N, 8*Kb)       packed branch weights, BN scale folded, bf16
    # shift_ref: (N, 1)          folded conv-bias + BatchNorm shift (f32)
    # o_ref:     (BB, N, TL)     output tile, already in final (B, C_total, L_out) layout
    # xs_ref:    (8*Kb, BB*TL)   VMEM scratch: stacked shifted input slabs (bf16)
    bb_n, kb, tl = x0_ref.shape

    # Build the K = 8*Kb contraction operand. Slab `blk` holds the input shifted by `blk`
    # 16-sample blocks. All scratch stores are lane-aligned (offsets bb*tl); the shifted
    # reads lower to XLU lane rotations (off the VALU/vst critical slots).
    for bb in range(bb_n):
        xx = jnp.concatenate([x0_ref[bb], x1_ref[bb]], axis=1)          # (Kb, TL+128)
        for blk in range(_NBLK):
            xs_ref[blk * kb:(blk + 1) * kb, bb * tl:(bb + 1) * tl] = xx[:, blk:blk + tl]

    # Single MXU matmul over the fused contraction dim, f32 accumulate.
    y = jnp.dot(w_ref[...], xs_ref[...], preferred_element_type=jnp.float32)  # (N, BB*TL)
    y = y + shift_ref[...]                                                     # (N,1) bcast
    y = jnp.clip(y, 0.0, 6.0)                                                  # ReLU6
    for bb in range(bb_n):
        o_ref[bb] = y[:, bb * tl:(bb + 1) * tl].astype(o_ref.dtype)


# ----------------------------- tiling heuristics -------------------------------
def _vmem_bytes(kb, n_total, tl, bb):
    """Rough per-step VMEM requirement (double-buffered pipeline + scratch + temps)."""
    ktot = _NBLK * kb
    return (2 * bb * kb * tl * 2            # x tiles (bf16, 2 pipeline buffers)
            + 2 * bb * kb * _HALO * 2       # halo blocks
            + 2 * n_total * ktot * 2        # weight slab (2 pipeline buffers)
            + 2 * n_total * 4               # shift
            + 2 * bb * n_total * tl * 4     # f32 output tiles
            + ktot * bb * tl * 2            # xs scratch
            + 2 * (kb * (tl + _HALO) * 2 + n_total * bb * tl * 4))   # kernel temporaries


def _choose_tile(l_out, kb, n_total, budget):
    # Largest lane tile (multiple of 128 -> unmasked stores) that fits the VMEM budget.
    cap = max(128, -(-l_out // 128) * 128)
    for cand in (2048, 1024, 512, 256, 128):
        if cand > cap:
            continue
        if _vmem_bytes(kb, n_total, cand, 1) <= budget:
            return cand
    return 128


def _choose_batch_block(batch, n_tiles, kb, n_total, tl, budget, max_bb=8):
    # Batch-block when per-step work is small, but keep >=2 grid steps (megacore / v7x).
    best = 1
    for d in range(1, min(batch, max_bb) + 1):
        if batch % d:
            continue
        if _vmem_bytes(kb, n_total, tl, d) > budget:
            continue
        if n_tiles == 1 and batch >= 2 and batch // d < 2:
            continue
        best = d
    return best


# ----------------------------- wrapper ----------------------------------------
def multi_features(x, all_params, eps=1e-5):
    """x: (B, C_in, L) float32.
    all_params: list of 4 tuples (w, b, gamma, beta, mean, var) for the 4 branches.
    (BatchNorm is applied with running statistics, i.e. inference-mode forward.)"""
    B, C_in, L = x.shape
    if L < _STRIDE:
        raise ValueError("sequence length must be >= 16")
    L_out = (L - _STRIDE) // _STRIDE + 1
    Kb = C_in * _STRIDE
    KTot = _NBLK * Kb
    N_total = sum(int(p[0].shape[0]) for p in all_params)

    # ---- fold the four Conv+BN branches into one packed weight slab / shift pair ----
    w_slabs, shifts = [], []
    for (w, b, gamma, beta, mean, var), (k, pad) in zip(all_params, _CFGS):
        c_out = w.shape[0]
        s = gamma / jnp.sqrt(var + eps)                        # BN scale
        off = _MAX_PAD - pad                                   # tap offset inside 128-window
        w_full = jnp.zeros((c_out, C_in, _WIN), jnp.float32)
        w_full = w_full.at[:, :, off:off + k].set(w.astype(jnp.float32))
        w_slabs.append(w_full * s[:, None, None])              # fold BN scale into weights
        shifts.append((b - mean) * s + beta)                   # folded conv-bias + BN shift
    w_all = jnp.concatenate(w_slabs, axis=0)                   # (N, C_in, 128) f32
    shift = jnp.concatenate(shifts, axis=0).reshape(N_total, 1).astype(jnp.float32)
    # (N, C_in, 8, 16) -> (N, 8, C_in, 16) -> (N, 8*Kb): index = blk*Kb + c*16 + s
    w_flat = (w_all.reshape(N_total, C_in, _NBLK, _STRIDE)
              .transpose(0, 2, 1, 3).reshape(N_total, KTot)
              .astype(jnp.bfloat16))                           # bf16 MXU operand

    # ---- VMEM budget / tiling decisions -------------------------------------------
    try:
        phys_vmem = int(pltpu.get_tpu_info().vmem_capacity_bytes)
    except Exception:
        phys_vmem = 64 * 1024 * 1024                           # conservative (v7x per-TC)
    budget = min(phys_vmem // 3, 24 * 1024 * 1024)
    tl = _choose_tile(L_out, Kb, N_total, budget)
    n_tiles = -(-L_out // tl)
    L_out_p = n_tiles * tl
    BB = _choose_batch_block(B, n_tiles, Kb, N_total, tl, budget)

    # ---- block-transpose x (bf16): lanes = conv output positions, minimal padding ---
    rows = n_tiles * tl + _HALO                                # +128-lane halo for last tile
    right = rows * _STRIDE - (L + _MAX_PAD)                    # always >= 0
    x_bf = x.astype(jnp.bfloat16)
    x_pad = jnp.pad(x_bf, ((0, 0), (0, 0), (_MAX_PAD, right)))
    x_blk = (x_pad.reshape(B, C_in, rows, _STRIDE)
             .transpose(0, 1, 3, 2).reshape(B, Kb, rows))

    need = _vmem_bytes(Kb, N_total, tl, BB)
    vmem_limit = int(min(0.9 * phys_vmem, max(2 * need, 16 * 1024 * 1024)))
    flops = 2 * B * L_out_p * N_total * KTot
    bytes_accessed = (2 * B * n_tiles * Kb * (tl + _HALO)      # bf16 x tiles + halos
                      + 2 * N_total * KTot + 4 * N_total       # weights + shift
                      + 4 * B * N_total * L_out_p)             # f32 output

    halo_blocks = tl // _HALO
    out = pl.pallas_call(
        _fused_conv_bn_relu6_kernel,
        out_shape=jax.ShapeDtypeStruct((B, N_total, L_out_p), x.dtype),
        grid=(B // BB, n_tiles),
        in_specs=[
            pl.BlockSpec((BB, Kb, tl), lambda b, i: (b, 0, i)),                      # tile i
            pl.BlockSpec((BB, Kb, _HALO), lambda b, i: (b, 0, (i + 1) * halo_blocks)),  # halo
            pl.BlockSpec((N_total, KTot), lambda b, i: (0, 0)),                      # weights
            pl.BlockSpec((N_total, 1), lambda b, i: (0, 0)),                         # shift
        ],
        out_specs=pl.BlockSpec((BB, N_total, tl), lambda b, i: (b, 0, i)),
        scratch_shapes=[pltpu.VMEM((KTot, BB * tl), jnp.bfloat16)],
        compiler_params=pltpu.CompilerParams(
            dimension_semantics=("parallel", "parallel"),
            vmem_limit_bytes=vmem_limit,
        ),
        cost_estimate=pl.CostEstimate(
            flops=flops, transcendentals=0, bytes_accessed=bytes_accessed),
    )(x_blk, x_blk, w_flat, shift)

    return out[:, :, :L_out]


# ----------------------------- reference (for validation) ---------------------
def _reference(x, all_params, eps=1e-5):
    outs = []
    for (w, b, gamma, beta, mean, var), (k, pad) in zip(all_params, _CFGS):
        conv = lax.conv_general_dilated(
            x, w, window_strides=(_STRIDE,), padding=[(pad, pad)],
            dimension_numbers=("NCH", "OIH", "NCH"))
        conv = conv + b[None, :, None]
        s = gamma / jnp.sqrt(var + eps)
        y = (conv - mean[None, :, None]) * s[None, :, None] + beta[None, :, None]
        outs.append(jnp.clip(y, 0.0, 6.0))
    return jnp.concatenate(outs, axis=1)


# ----------------------------- parameter init ---------------------------------
def _init_params(key, in_channels, out_channels_list, kernel_sizes):
    params = []
    for oc, k in zip(out_channels_list, kernel_sizes):
        key, k1, k2, k3, k4, k5, k6 = jax.random.split(key, 7)
        w = jax.random.normal(k1, (oc, in_channels, k), jnp.float32) * 0.05
        b = jax.random.normal(k2, (oc,), jnp.float32) * 0.05
        gamma = 1.0 + 0.1 * jax.random.normal(k3, (oc,), jnp.float32)
        beta = 0.1 * jax.random.normal(k4, (oc,), jnp.float32)
        mean = 0.1 * jax.random.normal(k5, (oc,), jnp.float32)
        var = jnp.abs(jax.random.normal(k6, (oc,), jnp.float32)) + 0.5
        params.append((w, b, gamma, beta, mean, var))
    return params


if __name__ == "__main__":
    key = jax.random.PRNGKey(0)

    def run_case(key, B, C_in, L, out_channels):
        key, kx, kp = jax.random.split(key, 3)
        x = jax.random.normal(kx, (B, C_in, L), jnp.float32)
        params = _init_params(kp, C_in, out_channels, [16, 32, 64, 128])
        out = jax.block_until_ready(jax.jit(multi_features)(x, params))
        ref = _reference(x, params)
        L_out = (L - _STRIDE) // _STRIDE + 1
        assert out.shape == (B, sum(out_channels), L_out), out.shape
        err = float(jnp.max(jnp.abs(out - ref)))
        # bf16 MXU operands with f32 accumulate -> loosened tolerance.
        assert err < 5e-2, err
        return key

    # Small case from the module spec: B=2, C_in=4, L=256 -> L_out=16, 1 tile, BB=1.
    key = run_case(key, B=2, C_in=4, L=256, out_channels=[8, 8, 8, 8])
    # Longer-sequence case: exercises larger lane tile (512) and batch blocking (BB=2).
    key = run_case(key, B=4, C_in=4, L=8192, out_channels=[8, 8, 8, 8])

    print("KERNEL_OK")
</pallas_src>

<mosaic_0001>
module attributes {stable_mosaic.version = 11 : i64} {
  func.func @_fused_conv_bn_relu6_kernel(%arg0: i32, %arg1: i32, %arg2: memref<1x64x128xbf16, #tpu.memory_space<vmem>>, %arg3: memref<1x64x128xbf16, #tpu.memory_space<vmem>>, %arg4: memref<32x512xbf16, #tpu.memory_space<vmem>>, %arg5: memref<32x1xf32, #tpu.memory_space<vmem>>, %arg6: memref<1x32x128xf32, #tpu.memory_space<vmem>>, %arg7: memref<512x128xbf16, #tpu.memory_space<vmem>>) attributes {dimension_semantics = [#tpu.dimension_semantics<parallel>, #tpu.dimension_semantics<parallel>], iteration_bounds = array<i64: 2, 1>, scalar_prefetch = 0 : i64, scratch_operands = 1 : i64, tpu.core_type = #tpu.core_type<tc>, window_params = [{transform_indices = @transform_0, window_bounds = array<i64: 1, 64, 128>}, {transform_indices = @transform_1, window_bounds = array<i64: 1, 64, 128>}, {pipeline_mode = #tpu.pipeline_mode<synchronous>, transform_indices = @transform_2, window_bounds = array<i64: 32, 512>}, {pipeline_mode = #tpu.pipeline_mode<synchronous>, transform_indices = @transform_3, window_bounds = array<i64: 32, 1>}, {transform_indices = @transform_4, window_bounds = array<i64: 1, 32, 128>}]} {
    %c0 = arith.constant 0 : index
    %c0_0 = arith.constant 0 : index
    %c0_1 = arith.constant 0 : index
    %0 = vector.load %arg2[%c0, %c0_0, %c0_1] : memref<1x64x128xbf16, #tpu.memory_space<vmem>>, vector<1x64x128xbf16>
    %1 = vector.shape_cast %0 : vector<1x64x128xbf16> to vector<64x128xbf16>
    %c0_2 = arith.constant 0 : index
    %c0_3 = arith.constant 0 : index
    %c0_4 = arith.constant 0 : index
    %2 = vector.load %arg3[%c0_2, %c0_3, %c0_4] : memref<1x64x128xbf16, #tpu.memory_space<vmem>>, vector<1x64x128xbf16>
    %3 = vector.shape_cast %2 : vector<1x64x128xbf16> to vector<64x128xbf16>
    %4 = tpu.concatenate %1, %3 in 1 : vector<64x128xbf16>, vector<64x128xbf16> -> vector<64x256xbf16>
    %5 = vector.extract_strided_slice %4 {offsets = [0, 0], sizes = [64, 128], strides = [1, 1]} : vector<64x256xbf16> to vector<64x128xbf16>
    %c0_5 = arith.constant 0 : index
    %c0_6 = arith.constant 0 : index
    %6 = vector.load %arg7[%c0_5, %c0_6] : memref<512x128xbf16, #tpu.memory_space<vmem>>, vector<64x128xbf16>
    tpu.vector_store %arg7[%c0_5, %c0_6], %5 {strides = array<i32>} : memref<512x128xbf16, #tpu.memory_space<vmem>>, vector<64x128xbf16>,
    %7 = vector.extract_strided_slice %4 {offsets = [0, 1], sizes = [64, 128], strides = [1, 1]} : vector<64x256xbf16> to vector<64x128xbf16>
    %c64 = arith.constant 64 : index
    %c0_7 = arith.constant 0 : index
    %8 = vector.load %arg7[%c64, %c0_7] : memref<512x128xbf16, #tpu.memory_space<vmem>>, vector<64x128xbf16>
    tpu.vector_store %arg7[%c64, %c0_7], %7 {strides = array<i32>} : memref<512x128xbf16, #tpu.memory_space<vmem>>, vector<64x128xbf16>,
    %9 = vector.extract_strided_slice %4 {offsets = [0, 2], sizes = [64, 128], strides = [1, 1]} : vector<64x256xbf16> to vector<64x128xbf16>
    %c128 = arith.constant 128 : index
    %c0_8 = arith.constant 0 : index
    %10 = vector.load %arg7[%c128, %c0_8] : memref<512x128xbf16, #tpu.memory_space<vmem>>, vector<64x128xbf16>
    tpu.vector_store %arg7[%c128, %c0_8], %9 {strides = array<i32>} : memref<512x128xbf16, #tpu.memory_space<vmem>>, vector<64x128xbf16>,
    %11 = vector.extract_strided_slice %4 {offsets = [0, 3], sizes = [64, 128], strides = [1, 1]} : vector<64x256xbf16> to vector<64x128xbf16>
    %c192 = arith.constant 192 : index
    %c0_9 = arith.constant 0 : index
    %12 = vector.load %arg7[%c192, %c0_9] : memref<512x128xbf16, #tpu.memory_space<vmem>>, vector<64x128xbf16>
    tpu.vector_store %arg7[%c192, %c0_9], %11 {strides = array<i32>} : memref<512x128xbf16, #tpu.memory_space<vmem>>, vector<64x128xbf16>,
    %13 = vector.extract_strided_slice %4 {offsets = [0, 4], sizes = [64, 128], strides = [1, 1]} : vector<64x256xbf16> to vector<64x128xbf16>
    %c256 = arith.constant 256 : index
    %c0_10 = arith.constant 0 : index
    %14 = vector.load %arg7[%c256, %c0_10] : memref<512x128xbf16, #tpu.memory_space<vmem>>, vector<64x128xbf16>
    tpu.vector_store %arg7[%c256, %c0_10], %13 {strides = array<i32>} : memref<512x128xbf16, #tpu.memory_space<vmem>>, vector<64x128xbf16>,
    %15 = vector.extract_strided_slice %4 {offsets = [0, 5], sizes = [64, 128], strides = [1, 1]} : vector<64x256xbf16> to vector<64x128xbf16>
    %c320 = arith.constant 320 : index
    %c0_11 = arith.constant 0 : index
    %16 = vector.load %arg7[%c320, %c0_11] : memref<512x128xbf16, #tpu.memory_space<vmem>>, vector<64x128xbf16>
    tpu.vector_store %arg7[%c320, %c0_11], %15 {strides = array<i32>} : memref<512x128xbf16, #tpu.memory_space<vmem>>, vector<64x128xbf16>,
    %17 = vector.extract_strided_slice %4 {offsets = [0, 6], sizes = [64, 128], strides = [1, 1]} : vector<64x256xbf16> to vector<64x128xbf16>
    %c384 = arith.constant 384 : index
    %c0_12 = arith.constant 0 : index
    %18 = vector.load %arg7[%c384, %c0_12] : memref<512x128xbf16, #tpu.memory_space<vmem>>, vector<64x128xbf16>
    tpu.vector_store %arg7[%c384, %c0_12], %17 {strides = array<i32>} : memref<512x128xbf16, #tpu.memory_space<vmem>>, vector<64x128xbf16>,
    %19 = vector.extract_strided_slice %4 {offsets = [0, 7], sizes = [64, 128], strides = [1, 1]} : vector<64x256xbf16> to vector<64x128xbf16>
    %c448 = arith.constant 448 : index
    %c0_13 = arith.constant 0 : index
    %20 = vector.load %arg7[%c448, %c0_13] : memref<512x128xbf16, #tpu.memory_space<vmem>>, vector<64x128xbf16>
    tpu.vector_store %arg7[%c448, %c0_13], %19 {strides = array<i32>} : memref<512x128xbf16, #tpu.memory_space<vmem>>, vector<64x128xbf16>,
    %c0_14 = arith.constant 0 : index
    %c0_15 = arith.constant 0 : index
    %21 = vector.load %arg4[%c0_14, %c0_15] : memref<32x512xbf16, #tpu.memory_space<vmem>>, vector<32x512xbf16>
    %c0_16 = arith.constant 0 : index
    %c0_17 = arith.constant 0 : index
    %22 = vector.load %arg7[%c0_16, %c0_17] : memref<512x128xbf16, #tpu.memory_space<vmem>>, vector<512x128xbf16>
    %cst = arith.constant dense<0.000000e+00> : vector<32x128xf32>
    %23 = tpu.matmul %21, %22, %cst {dimension_numbers = #tpu.dot_dimension_numbers<[1], [0], [0], [1], [0, 0, 1, 1], [], []>} : vector<32x512xbf16>, vector<512x128xbf16>, vector<32x128xf32> -> vector<32x128xf32>
    %c0_18 = arith.constant 0 : index
    %c0_19 = arith.constant 0 : index
    %24 = vector.load %arg5[%c0_18, %c0_19] : memref<32x1xf32, #tpu.memory_space<vmem>>, vector<32x1xf32>
    %25 = vector.broadcast %24 : vector<32x1xf32> to vector<32x128xf32>
    %26 = arith.addf %23, %25 : vector<32x128xf32>
    %cst_20 = arith.constant 0.000000e+00 : f32
    %cst_21 = arith.constant 6.000000e+00 : f32
    %27 = vector.broadcast %cst_20 : f32 to vector<32x128xf32>
    %28 = arith.maximumf %27, %26 : vector<32x128xf32>
    %29 = vector.broadcast %cst_21 : f32 to vector<32x128xf32>
    %30 = arith.minimumf %29, %28 : vector<32x128xf32>
    %c0_22 = arith.constant 0 : index
    %c0_23 = arith.constant 0 : index
    %c0_24 = arith.constant 0 : index
    %31 = vector.load %arg6[%c0_22, %c0_23, %c0_24] : memref<1x32x128xf32, #tpu.memory_space<vmem>>, vector<1x32x128xf32>
    %32 = vector.shape_cast %31 : vector<1x32x128xf32> to vector<32x128xf32>
    %33 = vector.shape_cast %30 : vector<32x128xf32> to vector<1x32x128xf32>
    tpu.vector_store %arg6[%c0_22, %c0_23, %c0_24], %33 {strides = array<i32>} : memref<1x32x128xf32, #tpu.memory_space<vmem>>, vector<1x32x128xf32>,
    return
  }
  func.func @transform_0(%arg0: i32, %arg1: i32) -> (i32, i32, i32) {
    %c0_i32 = arith.constant 0 : i32
    %c0_i32_0 = arith.constant 0 : i32
    return %arg0, %c0_i32, %arg1 : i32, i32, i32
  }
  func.func @transform_1(%arg0: i32, %arg1: i32) -> (i32, i32, i32) {
    %c1_i32 = arith.constant 1 : i32
    %0 = arith.addi %arg1, %c1_i32 : i32
    %c1_i32_0 = arith.constant 1 : i32
    %1 = arith.muli %0, %c1_i32_0 : i32
    %c0_i32 = arith.constant 0 : i32
    %c0_i32_1 = arith.constant 0 : i32
    return %arg0, %c0_i32, %1 : i32, i32, i32
  }
  func.func @transform_2(%arg0: i32, %arg1: i32) -> (i32, i32) {
    %c0_i32 = arith.constant 0 : i32
    %c0_i32_0 = arith.constant 0 : i32
    %c0_i32_1 = arith.constant 0 : i32
    return %c0_i32, %c0_i32_0 : i32, i32
  }
  func.func @transform_3(%arg0: i32, %arg1: i32) -> (i32, i32) {
    %c0_i32 = arith.constant 0 : i32
    %c0_i32_0 = arith.constant 0 : i32
    %c0_i32_1 = arith.constant 0 : i32
    return %c0_i32, %c0_i32_0 : i32, i32
  }
  func.func @transform_4(%arg0: i32, %arg1: i32) -> (i32, i32, i32) {
    %c0_i32 = arith.constant 0 : i32
    %c0_i32_0 = arith.constant 0 : i32
    return %arg0, %c0_i32, %arg1 : i32, i32, i32
  }
}

</mosaic_0001>

<bundles_post_ra>
// kernel: multi_features.1
= control target key start
LH: loop header
LB: loop body
LE: loop exit
PB: predicated region body
PF: predicated region fallthrough
CT: control target
= control target key end

     0   :  { %s1219_s15 = smov 0   ;;  %s1221_s16 = smov 0   ;;  %s1432_s0 = inlined_call_operand.vmem [shape: bf16[2,64,256], index: 0, kind: input, shape index: {}, may-alias: {0,1}]   ;;  %s1433_s1 = inlined_call_operand.vmem [shape: bf16[2,64,256], index: 1, kind: input, shape index: {}, may-alias: {0,1}]   ;;  %s1434_s2 = inlined_call_operand.vmem [shape: bf16[32,512], index: 2, kind: input, shape index: {}]   ;;  %s1435_s3 = inlined_call_operand.vmem [shape: f32[32,1], index: 3, kind: input, shape index: {}]   ;;  %s1436_s4 = inlined_call_operand.vmem [shape: f32[2,32,128], index: 4, kind: output, shape index: {}]  }
   0x1   :  { %s1223_s17 = smov 0   ;;  %s1225_s18 = smov 0  }
   0x2   :  { %s1227_s19 = smov 0  }
   0x3 LB: > { %s26_s20 = sadd.s32 1, %s1180_s18  ;;  %p42_p1 = scmp.ne.s32.totalorder %s1172_s16, %s1168_s15  ;;  %s1184_s19 = sphi %s1227_s19, %s14_s19   ;;  %s1180_s18 = sphi %s1225_s18, %s1441_s18   ;;  %s1176_s17 = sphi %s1223_s17, %s1440_s17   ;;  %s1172_s16 = sphi %s1221_s16, %s1439_s16   ;;  %s1168_s15 = sphi %s1219_s15, %s1438_s15  }
   0x4   : > { %p28_p0 = scmp.ge.s32.totalorder %s26_s20, 2  ;;  %p43_p2 = scmp.eq.s32.totalorder %s1184_s19, 0 }
   0x5   : > { %s35_s23 = sadd.s32 1, %s1172_s16  ;;  %p979_p5 = scmp.ge.s32.totalorder %s1184_s19, 2 }
   0x6   : > { %s1443_s20 = smov (%p28_p0, %s26_s20), 0  ;;  %p1250_p3 = por %p43_p2, %p42_p1 }
   0x7   : > { %s30_s22 = ssub.s32 %s1180_s18, %s1443_s20  ;;  %174 = sbr.rel (%p979_p5) target bundleno = 32 (0x20), region = 24 }
   0x8   : > { %p33_p4 = scmp.eq.s32.totalorder %s30_s22, 0 }
   0xa   : > { %s1258_s24 = scalar_select %p33_p4, %s1172_s16, %s35_s23  }
   0xe   : > { %177 = sbr.rel (!%p1250_p3) target bundleno = 23 (0x17), region = 28  ;;  %s179_s25 = sand.u32 (%p1250_p3), 1, %s1172_s16  }
   0xf   : > { %s1017_s26 = sshll.u32 (%p1250_p3), %s1180_s18, 6  ;;  %s980_s27 = sshll.u32 (%p1250_p3), %s179_s25, 5 }
  0x10   : > { %s185_s30 = scalar_lea.vmem (%p1250_p3), %s1432_s0, %s1017_s26  ;;  %s181_s5 = scalar_lea.vmem (%p1250_p3), [#allocation3], %s980_s27 }
  0x11   : > { %v201_v0 = vld [vmem:[%s185_s30] sm:$0xf] (%p1250_p3)  ;;  %v203_v1 = vld [vmem:[%s185_s30 + $0x8] sm:$0xf] (%p1250_p3)  ;;  %v205_v2 = vld [vmem:[%s185_s30 + $0x10] sm:$0xf] (%p1250_p3) }
  0x12   : > { %202 = vst [vmem:[%s181_s5] sm:$0xf] (%p1250_p3), %v201_v0  ;;  %204 = vst [vmem:[%s181_s5 + $0x4] sm:$0xf] (%p1250_p3), %v203_v1  ;;  %v207_v3 = vld [vmem:[%s185_s30 + $0x18] sm:$0xf] (%p1250_p3) }
  0x13   : > { %v209_v4 = vld [vmem:[%s185_s30 + $0x20] sm:$0xf] (%p1250_p3)  ;;  %206 = vst [vmem:[%s181_s5 + $0x8] sm:$0xf] (%p1250_p3), %v205_v2  ;;  %208 = vst [vmem:[%s181_s5 + $0xc] sm:$0xf] (%p1250_p3), %v207_v3 }
  0x14   : > { %210 = vst [vmem:[%s181_s5 + $0x10] sm:$0xf] (%p1250_p3), %v209_v4  ;;  %v211_v5 = vld [vmem:[%s185_s30 + $0x28] sm:$0xf] (%p1250_p3)  ;;  %v213_v6 = vld [vmem:[%s185_s30 + $0x30] sm:$0xf] (%p1250_p3) }
  0x15   : > { %v215_v7 = vld [vmem:[%s185_s30 + $0x38] sm:$0xf]  ;;  %212 = vst [vmem:[%s181_s5 + $0x14] sm:$0xf] %v211_v5  ;;  %214 = vst [vmem:[%s181_s5 + $0x18] sm:$0xf] %v213_v6 }
  0x16   : > { %216 = vst [vmem:[%s181_s5 + $0x1c] sm:$0xf] %v215_v7 }
  0x17 PF: > { %255 = sbr.rel (!%p1250_p3) target bundleno = 32 (0x20), region = 69  ;;  %s257_s6 = sand.u32 (%p1250_p3), 1, %s1172_s16  }
  0x18   : > { %s1018_s7 = sshll.u32 (%p1250_p3), %s1180_s18, 6  ;;  %s983_s8 = sshll.u32 (%p1250_p3), %s257_s6, 5 }
  0x19   : > { %s908_s11 = scalar_lea.vmem (%p1250_p3), %s1433_s1, %s1018_s7  ;;  %s259_s12 = scalar_lea.vmem (%p1250_p3), [#allocation4], %s983_s8 }
  0x1a   : > { %v986_v8 = vld [vmem:[%s908_s11 + $0x4] sm:$0xf] (%p1250_p3)  ;;  %v987_v9 = vld [vmem:[%s908_s11 + $0xc] sm:$0xf] (%p1250_p3)  ;;  %v988_v10 = vld [vmem:[%s908_s11 + $0x14] sm:$0xf] (%p1250_p3) }
  0x1b   : > { %281 = vst [vmem:[%s259_s12] sm:$0xf] (%p1250_p3), %v986_v8  ;;  %283 = vst [vmem:[%s259_s12 + $0x4] sm:$0xf] (%p1250_p3), %v987_v9  ;;  %v989_v11 = vld [vmem:[%s908_s11 + $0x1c] sm:$0xf] (%p1250_p3) }
  0x1c   : > { %v990_v12 = vld [vmem:[%s908_s11 + $0x24] sm:$0xf] (%p1250_p3)  ;;  %285 = vst [vmem:[%s259_s12 + $0x8] sm:$0xf] (%p1250_p3), %v988_v10  ;;  %287 = vst [vmem:[%s259_s12 + $0xc] sm:$0xf] (%p1250_p3), %v989_v11 }
  0x1d   : > { %289 = vst [vmem:[%s259_s12 + $0x10] sm:$0xf] (%p1250_p3), %v990_v12  ;;  %v991_v13 = vld [vmem:[%s908_s11 + $0x2c] sm:$0xf] (%p1250_p3)  ;;  %v992_v14 = vld [vmem:[%s908_s11 + $0x34] sm:$0xf] (%p1250_p3) }
  0x1e   : > { %v993_v15 = vld [vmem:[%s908_s11 + $0x3c] sm:$0xf]  ;;  %291 = vst [vmem:[%s259_s12 + $0x14] sm:$0xf] %v991_v13  ;;  %293 = vst [vmem:[%s259_s12 + $0x18] sm:$0xf] %v992_v14 }
  0x1f   : > { %295 = vst [vmem:[%s259_s12 + $0x1c] sm:$0xf] %v993_v15 }
  0x20 PF: > { %p994_p6 = scmp.ge.s32.totalorder %s1184_s19, 1  ;;  %p333_p7 = scmp.lt.s32.totalorder %s1184_s19, 3 }
  0x22   : > { %p334_p8 = pnand %p994_p6, %p333_p7 }
  0x23   : > { %s340_s13 = sand.u32 (!%p334_p8), 1, %s1168_s15   ;;  %s1186_s23 = smov (!%p334_p8), 122   ;;  %v1136_v24 = vld [vmem:[%s1434_s2 + $0x4] ss:$16 sps:$4 sm:$0xff] (!%p334_p8)   ;;  %v1139_v25 = vld [vmem:[%s1434_s2 + $0xc] ss:$16 sps:$4 sm:$0xff] (!%p334_p8)  }
  0x24   : > { %337 = sbr.rel (%p334_p8) target bundleno = 498 (0x1f2), region = 110  ;;  %s995_s14 = sshll.u32 (!%p334_p8), %s340_s13, 5  ;;  %792 = vmatprep.mubr.bf16.mxu0 (!%p334_p8), %v1136_v24  ;;  %841 = vmatprep.mubr.bf16.mxu1 (!%p334_p8), %v1139_v25  ;;  %v1193_v26 = vmov (!%p334_p8), 0   ;;  %v697_v27 = vld [vmem:[%s1435_s3 + $0x8] sm:$0xff] (!%p334_p8)  ;;  %v696_v28 = vld [vmem:[%s1435_s3] sm:$0xff] (!%p334_p8)  ;;  %v698_v29 = vld [vmem:[%s1435_s3 + $0x10] sm:$0xff] (!%p334_p8) }
  0x25   : > { %s1278_s21 = scalar_lea.vmem (!%p334_p8), [#allocation3], %s995_s14  ;;  %s349_s22 = scalar_lea.vmem (!%p334_p8), [#allocation4], %s995_s14  ;;  %1125 = vset.pattern.permute.xlu1 (!%p334_p8), %v1193_v26  ;;  %1124 = vset.pattern.permute.xlu0 (!%p334_p8), %v1193_v26  ;;  %v699_v30 = vld [vmem:[%s1435_s3 + $0x18] sm:$0xff] (!%p334_p8)  ;;  %vm498_vm0 = vcmask (!%p334_p8), 1031168   ;;  %vm614_vm1 = vcmask (!%p334_p8), 998400   ;;  %vm556_vm2 = vcmask (!%p334_p8), 1014784  }
  0x26   : > { %v1281_v16 = vld [vmem:[%s1278_s21] sm:$0xff] (!%p334_p8)   ;;  %s1187_s25 = smov (!%p334_p8), 126   ;;  %s1188_s26 = smov (!%p334_p8), 124   ;;  %v1128_v18 = vld [vmem:[%s349_s22 + $0x8] sm:$0xff] (!%p334_p8)   ;;  %v1130_v20 = vld [vmem:[%s349_s22 + $0x10] sm:$0xff] (!%p334_p8)   ;;  %vm527_vm3 = vcmask (!%p334_p8), 1022976  }
  0x27   : > { %v1127_v17 = vld [vmem:[%s349_s22] sm:$0xff] (!%p334_p8)   ;;  %598 = vrot.lane.b32.xlu1 (!%p334_p8), %v1281_v16, %s1186_s23  ;;  %482 = vrot.lane.b32.xlu0 (!%p334_p8), %v1281_v16, %s1187_s25  ;;  %v1287_v19 = vld [vmem:[%s1278_s21 + $0x8] sm:$0xff] (!%p334_p8)   ;;  %s1189_s15 = smov (!%p334_p8), 125   ;;  %s1190_s27 = smov (!%p334_p8), 127   ;;  %vm469_vm4 = vcmask (!%p334_p8), 1039360   ;;  %vm643_vm5 = vcmask (!%p334_p8), 990208  }
  0x28   : > { %v1293_v21 = vld [vmem:[%s1278_s21 + $0x10] sm:$0xff] (!%p334_p8)   ;;  %v1132_v22 = vld [vmem:[%s349_s22 + $0x18] sm:$0xff] (!%p334_p8)   ;;  %s1191_s28 = smov (!%p334_p8), 121   ;;  %s1192_s29 = smov (!%p334_p8), 123   ;;  %vm585_vm6 = vcmask (!%p334_p8), 1006592  }
  0x29   : > { %v1299_v23 = vld [vmem:[%s1278_s21 + $0x18] sm:$0xff] (!%p334_p8)   ;;  %p380_p9 = scmp.lt.s32.totalorder (!%p334_p8), %s1176_s17, 1 }
  0x2b   : > { %600 = vrot.lane.b32.xlu1 %v1127_v17, %s1186_s23  ;;  %484 = vrot.lane.b32.xlu0 %v1127_v17, %s1187_s25  ;;  %s1445_s17 = smov (!%p380_p9, %s1176_s17), 1 }
  0x2c   : > { %s1019_s8 = sshll.u32 %s1445_s17, 5 }
  0x2d   : > { %s387_s11 = scalar_lea.vmem %s1436_s4, %s1019_s8 }
  0x2f   : > { %542 = vrot.lane.b32.xlu1 %v1127_v17, %s1188_s26  ;;  %540 = vrot.lane.b32.xlu0 %v1281_v16, %s1188_s26 }
  0x33   : > { %488 = vrot.lane.b32.xlu1 %v1128_v18, %s1187_s25  ;;  %486 = vrot.lane.b32.xlu0 %v1287_v19, %s1187_s25 }
  0x37   : > { %604 = vrot.lane.b32.xlu1 %v1128_v18, %s1186_s23  ;;  %602 = vrot.lane.b32.xlu0 %v1287_v19, %s1186_s23 }
  0x3b   : > { %546 = vrot.lane.b32.xlu1 %v1128_v18, %s1188_s26  ;;  %544 = vrot.lane.b32.xlu0 %v1287_v19, %s1188_s26 }
  0x3f   : > { %492 = vrot.lane.b32.xlu1 %v1130_v20, %s1187_s25  ;;  %490 = vrot.lane.b32.xlu0 %v1293_v21, %s1187_s25 }
  0x43   : > { %608 = vrot.lane.b32.xlu1 %v1130_v20, %s1186_s23  ;;  %606 = vrot.lane.b32.xlu0 %v1293_v21, %s1186_s23 }
  0x47   : > { %550 = vrot.lane.b32.xlu1 %v1130_v20, %s1188_s26  ;;  %548 = vrot.lane.b32.xlu0 %v1293_v21, %s1188_s26 }
  0x4b   : > { %496 = vrot.lane.b32.xlu1 %v1132_v22, %s1187_s25  ;;  %494 = vrot.lane.b32.xlu0 %v1299_v23, %s1187_s25 }
  0x4f   : > { %612 = vrot.lane.b32.xlu1 %v1132_v22, %s1186_s23  ;;  %610 = vrot.lane.b32.xlu0 %v1299_v23, %s1186_s23 }
  0x53   : > { %554 = vrot.lane.b32.xlu1 %v1132_v22, %s1188_s26  ;;  %552 = vrot.lane.b32.xlu0 %v1299_v23, %s1188_s26 }
  0x57   : > { %513 = vrot.lane.b32.xlu1 %v1127_v17, %s1189_s15  ;;  %511 = vrot.lane.b32.xlu0 %v1281_v16, %s1189_s15 }
  0x5b   : > { %455 = vrot.lane.b32.xlu1 %v1127_v17, %s1190_s27  ;;  %453 = vrot.lane.b32.xlu0 %v1281_v16, %s1190_s27 }
  0x5f   : > { %629 = vrot.lane.b32.xlu1 %v1127_v17, %s1191_s28  ;;  %627 = vrot.lane.b32.xlu0 %v1281_v16, %s1191_s28 }
  0x63   : > { %571 = vrot.lane.b32.xlu1 %v1127_v17, %s1192_s29  ;;  %569 = vrot.lane.b32.xlu0 %v1281_v16, %s1192_s29 }
  0x67   : > { %517 = vrot.lane.b32.xlu1 %v1128_v18, %s1189_s15  ;;  %515 = vrot.lane.b32.xlu0 %v1287_v19, %s1189_s15 }
  0x6b   : > { %459 = vrot.lane.b32.xlu1 %v1128_v18, %s1190_s27  ;;  %457 = vrot.lane.b32.xlu0 %v1287_v19, %s1190_s27 }
  0x6f   : > { %633 = vrot.lane.b32.xlu1 %v1128_v18, %s1191_s28  ;;  %631 = vrot.lane.b32.xlu0 %v1287_v19, %s1191_s28 }
  0x73   : > { %575 = vrot.lane.b32.xlu1 %v1128_v18, %s1192_s29  ;;  %573 = vrot.lane.b32.xlu0 %v1287_v19, %s1192_s29 }
  0x77   : > { %521 = vrot.lane.b32.xlu1 %v1130_v20, %s1189_s15  ;;  %519 = vrot.lane.b32.xlu0 %v1293_v21, %s1189_s15 }
  0x7b   : > { %463 = vrot.lane.b32.xlu1 %v1130_v20, %s1190_s27  ;;  %461 = vrot.lane.b32.xlu0 %v1293_v21, %s1190_s27 }
  0x7f   : > { %637 = vrot.lane.b32.xlu1 %v1130_v20, %s1191_s28  ;;  %635 = vrot.lane.b32.xlu0 %v1293_v21, %s1191_s28 }
  0x83   : > { %579 = vrot.lane.b32.xlu1 %v1130_v20, %s1192_s29  ;;  %577 = vrot.lane.b32.xlu0 %v1293_v21, %s1192_s29 }
  0x87   : > { %525 = vrot.lane.b32.xlu1 %v1132_v22, %s1189_s15  ;;  %523 = vrot.lane.b32.xlu0 %v1299_v23, %s1189_s15 }
  0x8b   : > { %467 = vrot.lane.b32.xlu1 %v1132_v22, %s1190_s27  ;;  %465 = vrot.lane.b32.xlu0 %v1299_v23, %s1190_s27 }
  0x8f   : > { %641 = vrot.lane.b32.xlu1 %v1132_v22, %s1191_s28  ;;  %639 = vrot.lane.b32.xlu0 %v1299_v23, %s1191_s28 }
  0x93   : > { %583 = vrot.lane.b32.xlu1 %v1132_v22, %s1192_s29  ;;  %581 = vrot.lane.b32.xlu0 %v1299_v23, %s1192_s29 }
  0x97   : > { %707 = vperm.xlu1 %1125, %v697_v27   ;;  %702 = vperm.xlu0 %1124, %v696_v28  }
  0x99   : > { %v599_v31 = vpop.permute.xlu1 %598  ;;  %v483_v32 = vpop.permute.xlu0 %482 }
  0x9b   : > { %712 = vperm.xlu1 %1125, %v698_v29   ;;  %717 = vperm.xlu0 %1124, %v699_v30  }
  0x9d   : > { %v601_v33 = vpop.permute.xlu1 %600  ;;  %v485_v34 = vpop.permute.xlu0 %484 }
  0x9e   : > { %v499_v35 = vsel %vm498_vm0, %v483_v32, %v485_v34  ;;  %v615_v36 = vsel %vm614_vm1, %v599_v31, %v601_v33 }
  0x9f   : > { %1020 = vmatprep.subr.bf16.mxu0 %v499_v35  ;;  %1048 = vmatprep.subr.bf16.mxu1 %v615_v36 }
  0xa0   : > { %1021 = vmatpush3.bf16.msra.mxu0 %v1281_v16 }
  0xa1   : > { %v543_v37 = vpop.permute.xlu1 %542  ;;  %v541_v38 = vpop.permute.xlu0 %540 }
  0xa2   : > { %v557_v39 = vsel %vm556_vm2, %v541_v38, %v543_v37 }
  0xa3   : > { %1049 = vmatpush3.bf16.msra.mxu1 %v557_v39 }
  0xa5   : > { %v489_v40 = vpop.permute.xlu1 %488  ;;  %v487_v41 = vpop.permute.xlu0 %486 }
  0xa6   : > { %v500_v42 = vsel %vm498_vm0, %v487_v41, %v489_v40 }
  0xa7   : > { %1022 = vmatprep.subr.bf16.mxu0 %v500_v42 }
  0xa8   : > { %1023 = vmatpush3.bf16.msra.mxu0 %v1287_v19 }
  0xa9   : > { %v605_v43 = vpop.permute.xlu1 %604  ;;  %v603_v44 = vpop.permute.xlu0 %602 }
  0xaa   : > { %v616_v45 = vsel %vm614_vm1, %v603_v44, %v605_v43 }
  0xab   : > { %1050 = vmatprep.subr.bf16.mxu1 %v616_v45  ;;  %v1134_v45 = vld [vmem:[%s1434_s2] ss:$16 sps:$4 sm:$0xff]  }
  0xad   : > { %v547_v46 = vpop.permute.xlu1 %546  ;;  %v545_v47 = vpop.permute.xlu0 %544 }
  0xae   : > { %v558_v48 = vsel %vm556_vm2, %v545_v47, %v547_v46  ;;  %v1140_v46 = vld [vmem:[%s1434_s2 + $0x24] ss:$16 sps:$4 sm:$0xff]  }
  0xaf   : > { %1051 = vmatpush3.bf16.msra.mxu1 %v558_v48 }
  0xb1   : > { %v493_v49 = vpop.permute.xlu1 %492  ;;  %v491_v50 = vpop.permute.xlu0 %490 }
  0xb2   : > { %v501_v51 = vsel %vm498_vm0, %v491_v50, %v493_v49 }
  0xb3   : > { %1024 = vmatprep.subr.bf16.mxu0 %v501_v51 }
  0xb4   : > { %1025 = vmatpush3.bf16.msra.mxu0 %v1293_v21 }
  0xb5   : > { %v609_v52 = vpop.permute.xlu1 %608  ;;  %v607_v53 = vpop.permute.xlu0 %606 }
  0xb6   : > { %v617_v54 = vsel %vm614_vm1, %v607_v53, %v609_v52  ;;  %v1137_v53 = vld [vmem:[%s1434_s2 + $0x8] ss:$16 sps:$4 sm:$0xff]  }
  0xb7   : > { %1052 = vmatprep.subr.bf16.mxu1 %v617_v54  ;;  %v1142_v54 = vld [vmem:[%s1434_s2 + $0x20] ss:$16 sps:$4 sm:$0xff]  }
  0xb9   : > { %v551_v55 = vpop.permute.xlu1 %550  ;;  %v549_v56 = vpop.permute.xlu0 %548 }
  0xba   : > { %v559_v57 = vsel %vm556_vm2, %v549_v56, %v551_v55  ;;  %v1143_v55 = vld [vmem:[%s1434_s2 + $0x2c] ss:$16 sps:$4 sm:$0xff]   ;;  %v1145_v56 = vld [vmem:[%s1434_s2 + $0x28] ss:$16 sps:$4 sm:$0xff]  }
  0xbb   : > { %1053 = vmatpush3.bf16.msra.mxu1 %v559_v57 }
  0xbd   : > { %v497_v58 = vpop.permute.xlu1 %496  ;;  %v495_v59 = vpop.permute.xlu0 %494 }
  0xbe   : > { %v502_v60 = vsel %vm498_vm0, %v495_v59, %v497_v58 }
  0xbf   : > { %1026 = vmatprep.subr.bf16.mxu0 %v502_v60 }
  0xc0   : > { %1027 = vmatpush3.bf16.msra.mxu0 %v1299_v23 }
  0xc1   : > { %v613_v61 = vpop.permute.xlu1 %612  ;;  %v611_v62 = vpop.permute.xlu0 %610 }
  0xc2   : > { %v618_v63 = vsel %vm614_vm1, %v611_v62, %v613_v61 }
  0xc3   : > { %1054 = vmatprep.subr.bf16.mxu1 %v618_v63 }
  0xc5   : > { %v555_v0 = vpop.permute.xlu1 %554  ;;  %v553_v1 = vpop.permute.xlu0 %552 }
  0xc6   : > { %v560_v2 = vsel %vm556_vm2, %v553_v1, %v555_v0 }
  0xc7   : > { %1055 = vmatpush3.bf16.msra.mxu1 %v560_v2 }
  0xc9   : > { %v514_v3 = vpop.permute.xlu1 %513  ;;  %v512_v4 = vpop.permute.xlu0 %511 }
  0xca   : > { %v528_v5 = vsel %vm527_vm3, %v512_v4, %v514_v3 }
  0xcb   : > { %1028 = vmatprep.subr.bf16.mxu0 %v528_v5 }
  0xcd   : > { %v456_v6 = vpop.permute.xlu1 %455  ;;  %v454_v7 = vpop.permute.xlu0 %453 }
  0xce   : > { %v470_v8 = vsel %vm469_vm4, %v454_v7, %v456_v6 }
  0xcf   : > { %1029 = vmatpush3.bf16.msra.mxu0 %v470_v8 }
  0xd1   : > { %v630_v9 = vpop.permute.xlu1 %629  ;;  %v628_v10 = vpop.permute.xlu0 %627 }
  0xd2   : > { %v644_v11 = vsel %vm643_vm5, %v628_v10, %v630_v9 }
  0xd3   : > { %1056 = vmatprep.subr.bf16.mxu1 %v644_v11 }
  0xd5   : > { %v572_v12 = vpop.permute.xlu1 %571  ;;  %v570_v13 = vpop.permute.xlu0 %569 }
  0xd6   : > { %v586_v14 = vsel %vm585_vm6, %v570_v13, %v572_v12 }
  0xd7   : > { %1057 = vmatpush3.bf16.msra.mxu1 %v586_v14 }
  0xd9   : > { %v518_v15 = vpop.permute.xlu1 %517  ;;  %v516_v16 = vpop.permute.xlu0 %515 }
  0xda   : > { %v529_v17 = vsel %vm527_vm3, %v516_v16, %v518_v15 }
  0xdb   : > { %1030 = vmatprep.subr.bf16.mxu0 %v529_v17 }
  0xdd   : > { %v460_v18 = vpop.permute.xlu1 %459  ;;  %v458_v19 = vpop.permute.xlu0 %457 }
  0xde   : > { %v471_v20 = vsel %vm469_vm4, %v458_v19, %v460_v18 }
  0xdf   : > { %1031 = vmatpush3.bf16.msra.mxu0 %v471_v20 }
  0xe1   : > { %v634_v21 = vpop.permute.xlu1 %633  ;;  %v632_v22 = vpop.permute.xlu0 %631 }
  0xe2   : > { %v645_v23 = vsel %vm643_vm5, %v632_v22, %v634_v21 }
  0xe3   : > { %1058 = vmatprep.subr.bf16.mxu1 %v645_v23 }
  0xe5   : > { %v576_v24 = vpop.permute.xlu1 %575  ;;  %v574_v25 = vpop.permute.xlu0 %573 }
  0xe6   : > { %v587_v26 = vsel %vm585_vm6, %v574_v25, %v576_v24 }
  0xe7   : > { %1059 = vmatpush3.bf16.msra.mxu1 %v587_v26 }
  0xe9   : > { %v522_v27 = vpop.permute.xlu1 %521  ;;  %v520_v28 = vpop.permute.xlu0 %519 }
  0xea   : > { %v530_v29 = vsel %vm527_vm3, %v520_v28, %v522_v27 }
  0xeb   : > { %1032 = vmatprep.subr.bf16.mxu0 %v530_v29 }
  0xed   : > { %v464_v30 = vpop.permute.xlu1 %463  ;;  %v462_v31 = vpop.permute.xlu0 %461 }
  0xee   : > { %v472_v32 = vsel %vm469_vm4, %v462_v31, %v464_v30 }
  0xef   : > { %1033 = vmatpush3.bf16.msra.mxu0 %v472_v32 }
  0xf1   : > { %v638_v33 = vpop.permute.xlu1 %637  ;;  %v636_v34 = vpop.permute.xlu0 %635 }
  0xf2   : > { %v646_v35 = vsel %vm643_vm5, %v636_v34, %v638_v33 }
  0xf3   : > { %1060 = vmatprep.subr.bf16.mxu1 %v646_v35 }
  0xf5   : > { %v580_v36 = vpop.permute.xlu1 %579  ;;  %v578_v37 = vpop.permute.xlu0 %577 }
  0xf6   : > { %v588_v38 = vsel %vm585_vm6, %v578_v37, %v580_v36 }
  0xf7   : > { %1061 = vmatpush3.bf16.msra.mxu1 %v588_v38 }
  0xf9   : > { %v526_v39 = vpop.permute.xlu1 %525  ;;  %v524_v40 = vpop.permute.xlu0 %523 }
  0xfa   : > { %v531_v41 = vsel %vm527_vm3, %v524_v40, %v526_v39 }
  0xfb   : > { %1034 = vmatprep.subr.bf16.mxu0 %v531_v41 }
  0xfd   : > { %v468_v42 = vpop.permute.xlu1 %467  ;;  %v466_v43 = vpop.permute.xlu0 %465 }
  0xfe   : > { %v473_v44 = vsel %vm469_vm4, %v466_v43, %v468_v42 }
  0xff   : > { %1035 = vmatpush3.bf16.msra.mxu0 %v473_v44 }
 0x101   : > { %v642_v47 = vpop.permute.xlu1 %641  ;;  %v640_v48 = vpop.permute.xlu0 %639 }
 0x102   : > { %v647_v49 = vsel %vm643_vm5, %v640_v48, %v642_v47  ;;  %793 = vmatmul.mubr.bf16.vlgmr.msra.gmra.mrb[0].mxu0 %v1134_v45 }
 0x103   : > { %1062 = vmatprep.subr.bf16.mxu1 %v647_v49  ;;  %800 = vmatprep.mubr.bf16.mxu0 %v1140_v46 }
 0x105   : > { %v584_v50 = vpop.permute.xlu1 %583  ;;  %v582_v51 = vpop.permute.xlu0 %581 }
 0x106   : > { %v589_v52 = vsel %vm585_vm6, %v582_v51, %v584_v50 }
 0x107   : > { %1063 = vmatpush3.bf16.msra.mxu1 %v589_v52 }
 0x10a   : > { %842 = vmatmul.mubr.bf16.vlgmr.msra.gmra.mrb[0].mxu1 %v1137_v53  ;;  %801 = vmatmul.mubr.bf16.gmra.mrb[4].mxu0 %v1142_v54 }
 0x10b   : > { %849 = vmatprep.mubr.bf16.mxu1 %v1143_v55 }
 0x112   : > { %850 = vmatmul.mubr.bf16.gmra.mrb[4].mxu1 %v1145_v56 }
 0x116   : > { %v703_v63 = vpop.permute.xlu0 %702  ;;  %v708_v0 = vpop.permute.xlu1 %707 }
 0x11a   : > { %v713_v18 = vpop.permute.xlu1 %712  ;;  %v718_v22 = vpop.permute.xlu0 %717 }
 0x1d5   : > { %v1036_v57 = vpop.f32.mrb[0].mxu0 }
 0x1d6   : > { %v1037_v58 = vpop.f32.mrb[1].mxu0 }
 0x1d7   : > { %v1038_v59 = vadd.f32 %v1037_v58, %v1036_v57  ;;  %v1039_v60 = vpop.f32.mrb[2].mxu0 }
 0x1d8   : > { %v1040_v61 = vpop.f32.mrb[3].mxu0 }
 0x1d9   : > { %v1041_v62 = vadd.f32 %v1040_v61, %v1039_v60  ;;  %v795_v2 = vadd.f32 %v1038_v59, %v703_v63 }
 0x1db   : > { %v798_v12 = vadd.f32 %v1041_v62, %v708_v0 }
 0x1dd   : > { %v1064_v1 = vpop.f32.mrb[0].mxu1  ;;  %v1042_v3 = vpop.f32.mrb[4].mxu0 }
 0x1de   : > { %v1065_v4 = vpop.f32.mrb[1].mxu1  ;;  %v1043_v5 = vpop.f32.mrb[5].mxu0 }
 0x1df   : > { %v1066_v6 = vadd.f32 %v1065_v4, %v1064_v1  ;;  %v1067_v7 = vpop.f32.mrb[2].mxu1  ;;  %v1044_v8 = vadd.f32 %v1043_v5, %v1042_v3  ;;  %v1045_v9 = vpop.f32.mrb[6].mxu0 }
 0x1e0   : > { %v1068_v10 = vpop.f32.mrb[3].mxu1  ;;  %v1046_v11 = vpop.f32.mrb[7].mxu0 }
 0x1e1   : > { %v844_v13 = vadd.f32 %v1066_v6, %v795_v2  ;;  %v1069_v14 = vadd.f32 %v1068_v10, %v1067_v7  ;;  %v1047_v15 = vadd.f32 %v1046_v11, %v1045_v9  ;;  %v803_v25 = vadd.f32 %v1044_v8, %v713_v18 }
 0x1e3   : > { %v858_v16 = vmax.f32 %v844_v13, 0.0  ;;  %v847_v17 = vadd.f32 %v1069_v14, %v798_v12  ;;  %v806_v29 = vadd.f32 %v1047_v15, %v718_v22 }
 0x1e5   : > { %v862_v19 = vmin.f32 %v858_v16, 6.0  ;;  %v859_v20 = vmax.f32 %v847_v17, 0.0  ;;  %v1070_v21 = vpop.f32.mrb[4].mxu1 }
 0x1e6   : > { %v1071_v23 = vpop.f32.mrb[5].mxu1 }
 0x1e7   : > { %866 = vst [vmem:[%s387_s11] sm:$0xff] %v862_v19  ;;  %v863_v24 = vmin.f32 %v859_v20, 6.0  ;;  %v1072_v26 = vadd.f32 %v1071_v23, %v1070_v21  ;;  %v1073_v27 = vpop.f32.mrb[6].mxu1 }
 0x1e8   : > { %v1074_v28 = vpop.f32.mrb[7].mxu1 }
 0x1e9   : > { %867 = vst [vmem:[%s387_s11 + $0x8] sm:$0xff] %v863_v24  ;;  %v852_v30 = vadd.f32 %v1072_v26, %v803_v25  ;;  %v1075_v31 = vadd.f32 %v1074_v28, %v1073_v27 }
 0x1eb   : > { %v860_v32 = vmax.f32 %v852_v30, 0.0  ;;  %v855_v33 = vadd.f32 %v1075_v31, %v806_v29 }
 0x1ed   : > { %v864_v34 = vmin.f32 %v860_v32, 6.0  ;;  %v861_v35 = vmax.f32 %v855_v33, 0.0 }
 0x1ef   : > { %868 = vst [vmem:[%s387_s11 + $0x10] sm:$0xff] %v864_v34  ;;  %v865_v36 = vmin.f32 %v861_v35, 6.0 }
 0x1f1   : > { %869 = vst [vmem:[%s387_s11 + $0x18] sm:$0xff] %v865_v36 }
 0x1f2 PF: > { %s14_s19 = sadd.s32 1, %s1184_s19   ;;  %s1438_s15 = smov %s1172_s16 }
 0x1f3   : > { %p11_p10 = scmp.ge.s32.totalorder %s14_s19, 4   ;;  %s1439_s16 = smov %s1258_s24 }
 0x1f4   : > { %s1440_s17 = smov %s1180_s18  ;;  %s1441_s18 = smov %s1443_s20 }
 0x1f5   :  { %13 = sbr.rel (!%p11_p10) target bundleno = 3 (0x3), region = 161 }

</bundles_post_ra>
